<compile_context>
chip_gen: v7x
topology: tpu7x:2x2x1
jax: 0.10.0
libtpu: 0.0.40
codegen_flags: <defaults>
</compile_context>

<pallas_src>
from collections import OrderedDict
import math

import jax
import jax.numpy as jnp
from jax.experimental import pallas as pl
from jax.experimental.pallas import tpu as pltpu


LANE = 128
_BN_EPS = 1e-5
_BN_SCALE = 1.0 / math.sqrt(1.0 + _BN_EPS)   # fresh BN: gamma=1, var=1, mean=0


def _round_up(x, m):
    return ((x + m - 1) // m) * m


def _pick_tile(dim, candidates):
    for c in candidates:
        if dim % c == 0:
            return c
    return dim


# ----------------------------------------------------------------------------
# Kernel A: fused 1x1 conv (matmul) + folded-BN bias + ReLU
# ----------------------------------------------------------------------------
def _pw_conv_relu_kernel(x_ref, w_ref, b_ref, o_ref):
    # x_ref: (tm, Cin) bf16, w_ref: (Cin, tn) bf16 (BN scale pre-folded),
    # b_ref: (1, tn) f32, o_ref: (tm, tn) bf16.
    acc = jnp.dot(x_ref[...], w_ref[...], preferred_element_type=jnp.float32)
    o_ref[...] = jnp.maximum(acc + b_ref[...], 0.0).astype(o_ref.dtype)


def pw_conv_relu(x2d, w, bias):
    """x2d: (M, Cin) pixel rows (bf16), w: (Cin, Ch) bf16. Returns (M, Ch) bf16."""
    M, Cin = x2d.shape
    Ch = w.shape[1]
    tm = min(512, M)                       # large row tiles; remainder masked
    tn = _pick_tile(Ch, (512, 256, 128))   # lane-dense output tiles
    grid = (pl.cdiv(M, tm), Ch // tn)
    return pl.pallas_call(
        _pw_conv_relu_kernel,
        out_shape=jax.ShapeDtypeStruct((M, Ch), jnp.bfloat16),
        grid_spec=pltpu.PrefetchScalarGridSpec(
            num_scalar_prefetch=0,
            grid=grid,
            in_specs=[
                pl.BlockSpec((tm, Cin), lambda i, j: (i, 0)),
                pl.BlockSpec((Cin, tn), lambda i, j: (0, j)),
                pl.BlockSpec((1, tn), lambda i, j: (0, j)),
            ],
            out_specs=pl.BlockSpec((tm, tn), lambda i, j: (i, j)),
        ),
        compiler_params=pltpu.CompilerParams(
            dimension_semantics=("parallel", "parallel")),
    )(x2d, w, bias)


# ----------------------------------------------------------------------------
# Kernel B: fused 3x3 conv (stride 1, pad 1) + folded-BN bias + ReLU.
# Grid = (batch, Cout-tiles, H-strips).  Each step DMAs an unpadded H-strip
# plus one clamped halo row above/below, zero-pads into a VMEM scratch, and
# accumulates the 9 taps as bf16 matmuls.  ky shifts are plain leading-dim
# slices of the scratch; kx shifts use an XLU rotate + border mask (no
# sublane-offset relayout copies).
# ----------------------------------------------------------------------------
def _conv3x3_relu_kernel(xb_ref, xt_ref, xbt_ref, w_ref, b_ref, o_ref,
                         xpad_ref):
    # xb_ref : (1, TH, W, Cin)  body strip (bf16)
    # xt_ref : (1, 1, W, Cin)   row just above the strip (clamped at border)
    # xbt_ref: (1, 1, W, Cin)   row just below the strip (clamped at border)
    # w_ref  : (3, 3, Cin, TCO) bf16, BN scale pre-folded
    # b_ref  : (1, TCO) f32
    # o_ref  : (1, TH, W, TCO)  bf16
    # xpad_ref: VMEM scratch (TH + 2, W, Cin) f32 -- H-halo-padded strip
    s = pl.program_id(2)
    ns = pl.num_programs(2)
    _, TH, W, TCO = o_ref.shape
    Cin = xb_ref.shape[3]
    L = TH * W

    # Build the H-padded strip once per step; halo rows zeroed at image edges.
    xpad_ref[1:TH + 1] = xb_ref[0].astype(jnp.float32)
    top = xt_ref[0, 0].astype(jnp.float32)
    bot = xbt_ref[0, 0].astype(jnp.float32)
    xpad_ref[0] = top * (s > 0).astype(jnp.float32)
    xpad_ref[TH + 1] = bot * (s < ns - 1).astype(jnp.float32)

    # Column index of each flattened pixel row (for masking the kx wrap).
    col = jax.lax.broadcasted_iota(jnp.int32, (TH, W, Cin), 1).reshape(L, Cin)

    acc = jnp.zeros((L, TCO), jnp.float32)
    for ky in range(3):
        # ky shift = leading-dim slice of the padded scratch: no relayout.
        xrow = xpad_ref[ky:ky + TH].reshape(L, Cin)
        for kx in range(3):
            dx = kx - 1
            if dx == 0:
                xs = xrow
            else:
                # Rotate along the flattened (row-major) pixel axis; the rows
                # that wrap across the W border are exactly the masked columns.
                xs = pltpu.roll(xrow, shift=(-dx) % L, axis=0)
                valid = (col > 0) if dx < 0 else (col < W - 1)
                xs = jnp.where(valid, xs, 0.0)
            acc = acc + jnp.dot(xs.astype(jnp.bfloat16), w_ref[ky, kx],
                                preferred_element_type=jnp.float32)

    y = jnp.maximum(acc + b_ref[...], 0.0)
    o_ref[0] = y.reshape(TH, W, TCO).astype(o_ref.dtype)


def conv3x3_relu(x, w, bias):
    """x: (N, H, W, Cin) bf16 NHWC, w: (3, 3, Cin, Cout) bf16. Returns bf16."""
    N, H, W, Cin = x.shape
    Cout = w.shape[3]
    th = 8 if H % 8 == 0 else H            # rows per H-strip
    tco = _pick_tile(Cout, (256, 128))     # lane-dense Cout tiles
    sh = H // th
    ct = Cout // tco

    body_spec = pl.BlockSpec((1, th, W, Cin), lambda n, c, s: (n, s, 0, 0))
    # Halo rows use block size 1 along H, so the index map returns the row
    # index directly (clamped at the image border; zeroed inside the kernel).
    top_spec = pl.BlockSpec(
        (1, 1, W, Cin),
        lambda n, c, s: (n, jnp.maximum(s * th - 1, 0), 0, 0))
    bot_spec = pl.BlockSpec(
        (1, 1, W, Cin),
        lambda n, c, s: (n, jnp.minimum((s + 1) * th, H - 1), 0, 0))

    return pl.pallas_call(
        _conv3x3_relu_kernel,
        out_shape=jax.ShapeDtypeStruct((N, H, W, Cout), jnp.bfloat16),
        grid_spec=pltpu.PrefetchScalarGridSpec(
            num_scalar_prefetch=0,
            grid=(N, ct, sh),
            in_specs=[
                body_spec,
                top_spec,
                bot_spec,
                pl.BlockSpec((3, 3, Cin, tco), lambda n, c, s: (0, 0, 0, c)),
                pl.BlockSpec((1, tco), lambda n, c, s: (0, c)),
            ],
            out_specs=pl.BlockSpec((1, th, W, tco),
                                   lambda n, c, s: (n, s, 0, c)),
            scratch_shapes=[pltpu.VMEM((th + 2, W, Cin), jnp.float32)],
        ),
        compiler_params=pltpu.CompilerParams(
            dimension_semantics=("parallel", "parallel", "parallel")),
    )(x, x, x, w, bias)


# ----------------------------------------------------------------------------
# Parameter construction (deterministic, mirrors _xavier_init + fresh BN).
# BN scale is folded into the weights; channel dims are zero-padded to 128.
# ----------------------------------------------------------------------------
def _xavier_uniform(key, kh, kw, cin, cout):
    fan_in = cin * kh * kw
    fan_out = cout * kh * kw
    bound = math.sqrt(6.0 / (fan_in + fan_out))
    return jax.random.uniform(key, (kh, kw, cin, cout), jnp.float32,
                              -bound, bound)


def _pad_hwio(w, cin_p, cout_p):
    _, _, cin, cout = w.shape
    return jnp.pad(w, ((0, 0), (0, 0), (0, cin_p - cin), (0, cout_p - cout)))


def make_params(in_channels, hidden, out_channels, num_extra, key):
    hidden_p = _round_up(hidden, LANE)
    cout_p = _round_up(out_channels, LANE)
    k1, k2, *kex = jax.random.split(key, 2 + num_extra)

    # 1x1 conv; conv bias=0, BN beta=0, mean=0 -> folded bias = 0.
    w1 = _xavier_uniform(k1, 1, 1, in_channels, hidden)[0, 0] * _BN_SCALE
    w1 = jnp.pad(w1, ((0, 0), (0, hidden_p - hidden)))
    b1 = jnp.zeros((1, hidden_p), jnp.float32)

    # 3x3 conv (bias=False) + BN folded.
    w2 = _pad_hwio(_xavier_uniform(k2, 3, 3, hidden, out_channels) * _BN_SCALE,
                   hidden_p, cout_p)
    b2 = jnp.zeros((1, cout_p), jnp.float32)

    extra = []
    for ke in kex:
        we = _pad_hwio(
            _xavier_uniform(ke, 3, 3, out_channels, out_channels) * _BN_SCALE,
            cout_p, cout_p)
        extra.append({"w": we.astype(jnp.bfloat16),
                      "b": jnp.zeros((1, cout_p), jnp.float32)})

    return {"w1": w1.astype(jnp.bfloat16), "b1": b1,
            "w2": w2.astype(jnp.bfloat16), "b2": b2,
            "extra": extra, "c_out": out_channels}


# ----------------------------------------------------------------------------
# Forward pass (matches ReducedAVTN2.forward structure)
# ----------------------------------------------------------------------------
def reduced_avtn2_forward(x_nhwc, params):
    # TODO(synk): self.features(x) -- external truncated backbone -- identity.
    N, H, W, Cin = x_nhwc.shape
    xb = x_nhwc.astype(jnp.bfloat16)

    # adjust_layer
    h = pw_conv_relu(xb.reshape(N * H * W, Cin), params["w1"], params["b1"])
    h = h.reshape(N, H, W, -1)
    x = conv3x3_relu(h, params["w2"], params["b2"])

    outputs = [x]
    for blk in params["extra"]:
        x = conv3x3_relu(x, blk["w"], blk["b"])
        outputs.append(x)

    c_out = params["c_out"]
    return OrderedDict(
        (str(i), v[..., :c_out].astype(jnp.float32))
        for i, v in enumerate(outputs))


# ----------------------------------------------------------------------------
# Plain-JAX reference (same bf16 quantization points; correctness check only)
# ----------------------------------------------------------------------------
def reference_forward(x_nhwc, params):
    x = x_nhwc.astype(jnp.bfloat16)
    N, H, W, Cin = x.shape

    h = jnp.dot(x.reshape(N * H * W, Cin), params["w1"],
                preferred_element_type=jnp.float32)
    h = jnp.maximum(h + params["b1"], 0.0).astype(jnp.bfloat16)
    h = h.reshape(N, H, W, -1)

    def c3(z, w, b):
        y = jax.lax.conv_general_dilated(
            z, w, (1, 1), [(1, 1), (1, 1)],
            dimension_numbers=("NHWC", "HWIO", "NHWC"),
            preferred_element_type=jnp.float32)
        return jnp.maximum(y + b.reshape(1, 1, 1, -1), 0.0).astype(jnp.bfloat16)

    y = c3(h, params["w2"], params["b2"])
    outs = [y]
    for blk in params["extra"]:
        y = c3(y, blk["w"], blk["b"])
        outs.append(y)

    c_out = params["c_out"]
    return OrderedDict(
        (str(i), v[..., :c_out].astype(jnp.float32)) for i, v in enumerate(outs))


if __name__ == "__main__":
    # Small stand-in shapes: backbone feature map with 8 channels, hidden=32
    # (stands in for the module's hidden_size=1024), out_channels=16, 2 extra
    # blocks.  hidden/out channel dims are padded to 128 internally.
    N, C_IN, H, W = 2, 8, 16, 16
    HIDDEN, C_OUT, NUM_EXTRA = 32, 16, 2

    key = jax.random.PRNGKey(0)
    kx, kp = jax.random.split(key)
    x_nchw = jax.random.normal(kx, (N, C_IN, H, W), jnp.float32)  # PyTorch NCHW
    x_nhwc = jnp.transpose(x_nchw, (0, 2, 3, 1))                  # kernel NHWC

    params = make_params(C_IN, HIDDEN, C_OUT, NUM_EXTRA, kp)

    out = reduced_avtn2_forward(x_nhwc, params)
    jax.block_until_ready(out)

    ref = reference_forward(x_nhwc, params)
    for k in out:
        assert out[k].shape == ref[k].shape, (k, out[k].shape, ref[k].shape)
        assert jnp.allclose(out[k], ref[k], atol=2e-2, rtol=2e-2), k

    print("KERNEL_OK")
</pallas_src>

<mosaic_0001>
module attributes {stable_mosaic.version = 11 : i64} {
  func.func @_pw_conv_relu_kernel(%arg0: i32, %arg1: i32, %arg2: memref<512x8xbf16, #tpu.memory_space<vmem>>, %arg3: memref<8x128xbf16, #tpu.memory_space<vmem>>, %arg4: memref<1x128xf32, #tpu.memory_space<vmem>>, %arg5: memref<512x128xbf16, #tpu.memory_space<vmem>>) attributes {dimension_semantics = [#tpu.dimension_semantics<parallel>, #tpu.dimension_semantics<parallel>], iteration_bounds = array<i64: 1, 1>, scalar_prefetch = 0 : i64, scratch_operands = 0 : i64, tpu.core_type = #tpu.core_type<tc>, window_params = [{transform_indices = @transform_0, window_bounds = array<i64: 512, 8>}, {transform_indices = @transform_1, window_bounds = array<i64: 8, 128>}, {transform_indices = @transform_2, window_bounds = array<i64: 1, 128>}, {transform_indices = @transform_3, window_bounds = array<i64: 512, 128>}]} {
    %c0 = arith.constant 0 : index
    %c0_0 = arith.constant 0 : index
    %0 = vector.load %arg2[%c0, %c0_0] : memref<512x8xbf16, #tpu.memory_space<vmem>>, vector<512x8xbf16>
    %c0_1 = arith.constant 0 : index
    %c0_2 = arith.constant 0 : index
    %1 = vector.load %arg3[%c0_1, %c0_2] : memref<8x128xbf16, #tpu.memory_space<vmem>>, vector<8x128xbf16>
    %cst = arith.constant dense<0.000000e+00> : vector<512x128xf32>
    %2 = tpu.matmul %0, %1, %cst {dimension_numbers = #tpu.dot_dimension_numbers<[1], [0], [0], [1], [0, 0, 1, 1], [], []>} : vector<512x8xbf16>, vector<8x128xbf16>, vector<512x128xf32> -> vector<512x128xf32>
    %c0_3 = arith.constant 0 : index
    %c0_4 = arith.constant 0 : index
    %3 = vector.load %arg4[%c0_3, %c0_4] : memref<1x128xf32, #tpu.memory_space<vmem>>, vector<1x128xf32>
    %4 = vector.broadcast %3 : vector<1x128xf32> to vector<512x128xf32>
    %5 = arith.addf %2, %4 : vector<512x128xf32>
    %cst_5 = arith.constant 0.000000e+00 : f32
    %6 = vector.broadcast %cst_5 : f32 to vector<512x128xf32>
    %7 = arith.maximumf %5, %6 : vector<512x128xf32>
    %8 = arith.truncf %7 : vector<512x128xf32> to vector<512x128xbf16>
    %c0_6 = arith.constant 0 : index
    %c0_7 = arith.constant 0 : index
    %9 = vector.load %arg5[%c0_6, %c0_7] : memref<512x128xbf16, #tpu.memory_space<vmem>>, vector<512x128xbf16>
    tpu.vector_store %arg5[%c0_6, %c0_7], %8 {strides = array<i32>} : memref<512x128xbf16, #tpu.memory_space<vmem>>, vector<512x128xbf16>,
    return
  }
  func.func @transform_0(%arg0: i32, %arg1: i32) -> (i32, i32) {
    %c0_i32 = arith.constant 0 : i32
    %c0_i32_0 = arith.constant 0 : i32
    return %arg0, %c0_i32 : i32, i32
  }
  func.func @transform_1(%arg0: i32, %arg1: i32) -> (i32, i32) {
    %c0_i32 = arith.constant 0 : i32
    %c0_i32_0 = arith.constant 0 : i32
    return %c0_i32, %arg1 : i32, i32
  }
  func.func @transform_2(%arg0: i32, %arg1: i32) -> (i32, i32) {
    %c0_i32 = arith.constant 0 : i32
    %c0_i32_0 = arith.constant 0 : i32
    return %c0_i32, %arg1 : i32, i32
  }
  func.func @transform_3(%arg0: i32, %arg1: i32) -> (i32, i32) {
    %c0_i32 = arith.constant 0 : i32
    return %arg0, %arg1 : i32, i32
  }
}

</mosaic_0001>

<bundles_post_ra>
// kernel: tpu_custom_call.1
= control target key start
LH: loop header
LB: loop body
LE: loop exit
PB: predicated region body
PF: predicated region fallthrough
CT: control target
= control target key end

     0   :  { %vm345_vm0 = vcmask 1043456   ;;  %vm248_vm1 = vcmask 64512   ;;  %s1819_s0 = inlined_call_operand.vmem [shape: bf16[512,8], index: 0, kind: input, shape index: {}]   ;;  %s1820_s1 = inlined_call_operand.vmem [shape: bf16[8,128], index: 1, kind: input, shape index: {}]   ;;  %s1821_s2 = inlined_call_operand.vmem [shape: f32[1,128], index: 2, kind: input, shape index: {}]   ;;  %s1822_s3 = inlined_call_operand.hbm [shape: bf16[512,128], index: 3, kind: output, shape index: {}]  }
   0x1   :  { %v80_v0 = vld [vmem:[%s1820_s1] sm:$0xf]  ;;  %v1530_v4 = vld [vmem:[%s1819_s0 + $0x8] sm:$0xff]   ;;  %v1532_v6 = vld [vmem:[%s1819_s0 + $0x10] sm:$0xff]  }
   0x2   :  { %v1528_v1 = vld [vmem:[%s1819_s0] sm:$0xff]   ;;  %1523 = vmatprep.subr.msk.bf16.mxu0 %vm345_vm0, %v80_v0  ;;  %1524 = vmatprep.subr.msk.bf16.mxu1 %vm345_vm0, %v80_v0  ;;  %v347_v2 = vsel %vm345_vm0, %v80_v0, 0  ;;  %v1531_v5 = vld [vmem:[%s1819_s0 + $0x88] sm:$0xff]   ;;  %v1533_v7 = vld [vmem:[%s1819_s0 + $0x90] sm:$0xff]  }
   0x3   :  { %1456 = vmatpush3.bf16.msra.mxu0 %v347_v2  ;;  %1522 = vmatpush3.bf16.msra.mxu1 %v347_v2  ;;  %v1529_v3 = vld [vmem:[%s1819_s0 + $0x80] sm:$0xff]   ;;  %v1534_v8 = vld [vmem:[%s1819_s0 + $0x18] sm:$0xff]   ;;  %v1538_v12 = vld [vmem:[%s1819_s0 + $0x28] sm:$0xff]  }
   0x4   :  { %1457 = vmatprep.mubr.msk.bf16.mxu0 %vm248_vm1, %v1528_v1  ;;  %1489 = vmatprep.mubr.msk.bf16.mxu1 %vm248_vm1, %v1529_v3  ;;  %v1535_v9 = vld [vmem:[%s1819_s0 + $0x98] sm:$0xff]   ;;  %v1536_v10 = vld [vmem:[%s1819_s0 + $0x20] sm:$0xff]   ;;  %v1539_v13 = vld [vmem:[%s1819_s0 + $0xa8] sm:$0xff]  }
   0x5   :  { %v1537_v11 = vld [vmem:[%s1819_s0 + $0xa0] sm:$0xff]   ;;  %v1540_v14 = vld [vmem:[%s1819_s0 + $0x30] sm:$0xff]   ;;  %v1542_v16 = vld [vmem:[%s1819_s0 + $0x38] sm:$0xff]  }
   0x6   :  { %1458 = vmatmul.mubr.msk.bf16.vlgmr.msra.gmra.mrb[0].mxu0 %vm248_vm1, %v1530_v4  ;;  %1490 = vmatmul.mubr.msk.bf16.vlgmr.msra.gmra.mrb[0].mxu1 %vm248_vm1, %v1531_v5  ;;  %v1541_v15 = vld [vmem:[%s1819_s0 + $0xb0] sm:$0xff]   ;;  %v1543_v17 = vld [vmem:[%s1819_s0 + $0xb8] sm:$0xff]   ;;  %v1544_v18 = vld [vmem:[%s1819_s0 + $0x40] sm:$0xff]  }
   0x7   :  { %1461 = vmatprep.mubr.msk.bf16.mxu0 %vm248_vm1, %v1532_v6  ;;  %1493 = vmatprep.mubr.msk.bf16.mxu1 %vm248_vm1, %v1533_v7  ;;  %v1545_v19 = vld [vmem:[%s1819_s0 + $0xc0] sm:$0xff]  }
   0xe   :  { %1462 = vmatmul.mubr.msk.bf16.gmra.mrb[4].mxu0 %vm248_vm1, %v1534_v8  ;;  %1494 = vmatmul.mubr.msk.bf16.gmra.mrb[4].mxu1 %vm248_vm1, %v1535_v9 }
   0xf   :  { %1465 = vmatprep.mubr.msk.bf16.mxu0 %vm248_vm1, %v1536_v10  ;;  %1497 = vmatprep.mubr.msk.bf16.mxu1 %vm248_vm1, %v1537_v11 }
  0x16   :  { %1466 = vmatmul.mubr.msk.bf16.gmra.mrb[8].mxu0 %vm248_vm1, %v1538_v12  ;;  %1498 = vmatmul.mubr.msk.bf16.gmra.mrb[8].mxu1 %vm248_vm1, %v1539_v13 }
  0x17   :  { %1469 = vmatprep.mubr.msk.bf16.mxu0 %vm248_vm1, %v1540_v14  ;;  %1501 = vmatprep.mubr.msk.bf16.mxu1 %vm248_vm1, %v1541_v15 }
  0x1e   :  { %1470 = vmatmul.mubr.msk.bf16.gmra.mrb[12].mxu0 %vm248_vm1, %v1542_v16  ;;  %1502 = vmatmul.mubr.msk.bf16.gmra.mrb[12].mxu1 %vm248_vm1, %v1543_v17 }
  0x1f   :  { %1473 = vmatprep.mubr.msk.bf16.mxu0 %vm248_vm1, %v1544_v18  ;;  %1505 = vmatprep.mubr.msk.bf16.mxu1 %vm248_vm1, %v1545_v19 }
  0x20   :  { %8 = vsyncpa [#allocation3], 0  ;;  %v1546_v20 = vld [vmem:[%s1819_s0 + $0x48] sm:$0xff]   ;;  %v1548_v22 = vld [vmem:[%s1819_s0 + $0x50] sm:$0xff]  }
  0x21   :  { %v1547_v21 = vld [vmem:[%s1819_s0 + $0xc8] sm:$0xff]   ;;  %v1549_v23 = vld [vmem:[%s1819_s0 + $0xd0] sm:$0xff]   ;;  %v1550_v24 = vld [vmem:[%s1819_s0 + $0x58] sm:$0xff]  }
  0x22   :  { %v1551_v25 = vld [vmem:[%s1819_s0 + $0xd8] sm:$0xff]   ;;  %v1552_v26 = vld [vmem:[%s1819_s0 + $0x60] sm:$0xff]   ;;  %v1554_v28 = vld [vmem:[%s1819_s0 + $0x68] sm:$0xff]  }
  0x23   :  { %v1553_v27 = vld [vmem:[%s1819_s0 + $0xe0] sm:$0xff]   ;;  %v1555_v29 = vld [vmem:[%s1819_s0 + $0xe8] sm:$0xff]   ;;  %v1556_v30 = vld [vmem:[%s1819_s0 + $0x70] sm:$0xff]  }
  0x24   :  { %v1557_v31 = vld [vmem:[%s1819_s0 + $0xf0] sm:$0xff]   ;;  %v1558_v32 = vld [vmem:[%s1819_s0 + $0x78] sm:$0xff]   ;;  %v1741_v34 = vld [vmem:[%s1821_s2] ss:$0 sm:$0xff] }
  0x25   :  { %v1559_v33 = vld [vmem:[%s1819_s0 + $0xf8] sm:$0xff]   ;;  %s1584_s0 = smov [#allocation2]  }
  0x26   :  { %1474 = vmatmul.mubr.msk.bf16.gmra.mrb[16].mxu0 %vm248_vm1, %v1546_v20  ;;  %1506 = vmatmul.mubr.msk.bf16.gmra.mrb[16].mxu1 %vm248_vm1, %v1547_v21  ;;  %s1027_s2 = sshll.u32 %s1584_s0, 4  ;;  %s1028_s2 = int_to_ptr.vmem [resolvable:$true] %s1027_s2 }
  0x27   :  { %1477 = vmatprep.mubr.msk.bf16.mxu0 %vm248_vm1, %v1548_v22  ;;  %1509 = vmatprep.mubr.msk.bf16.mxu1 %vm248_vm1, %v1549_v23  ;;  %s1560_s23 = scalar_lea.vmem %s1028_s2, 4096  ;;  %p1565_p1 = scmp.lt.s32.totalorder %s1028_s2, %s1028_s2 }
  0x28   :  { %p1561_p0 = scmp.ne.s32.totalorder %s1028_s2, %s1560_s23  ;;  %p1566_p2 = scmp.lt.s32.totalorder %s1560_s23, %s1560_s23 }
  0x2a   :  { %p1567_p3 = por %p1566_p2, %p1565_p1 }
  0x2c   :  { %p1568_p4 = pnand %p1567_p3, %p1561_p0 }
  0x2e   :  { %1478 = vmatmul.mubr.msk.bf16.gmra.mrb[20].mxu0 %vm248_vm1, %v1550_v24  ;;  %1510 = vmatmul.mubr.msk.bf16.gmra.mrb[20].mxu1 %vm248_vm1, %v1551_v25 }
  0x2f   :  { %1481 = vmatprep.mubr.msk.bf16.mxu0 %vm248_vm1, %v1552_v26  ;;  %1513 = vmatprep.mubr.msk.bf16.mxu1 %vm248_vm1, %v1553_v27 }
  0x36   :  { %1482 = vmatmul.mubr.msk.bf16.gmra.mrb[24].mxu0 %vm248_vm1, %v1554_v28  ;;  %1514 = vmatmul.mubr.msk.bf16.gmra.mrb[24].mxu1 %vm248_vm1, %v1555_v29 }
  0x37   :  { %1485 = vmatprep.mubr.msk.bf16.mxu0 %vm248_vm1, %v1556_v30  ;;  %1517 = vmatprep.mubr.msk.bf16.mxu1 %vm248_vm1, %v1557_v31 }
  0x3e   :  { %1486 = vmatmul.mubr.msk.bf16.gmra.mrb[28].mxu0 %vm248_vm1, %v1558_v32  ;;  %1518 = vmatmul.mubr.msk.bf16.gmra.mrb[28].mxu1 %vm248_vm1, %v1559_v33 }
  0xd9   :  { %v1459_v35 = vpop.f32.mrb[0].mxu0  ;;  %v1491_v37 = vpop.f32.mrb[0].mxu1 }
  0xda   :  { %v392_v36 = vadd.f32 %v1459_v35, %v1741_v34  ;;  %v383_v38 = vpop.f32.mrb[1].mxu0  ;;  %v520_v39 = vadd.f32 %v1491_v37, %v1741_v34  ;;  %v511_v41 = vpop.f32.mrb[1].mxu1 }
  0xdb   :  { %v384_v40 = vadd.f32 %v1741_v34, %v383_v38  ;;  %v1460_v42 = vpop.f32.mrb[2].mxu0  ;;  %v512_v43 = vadd.f32 %v1741_v34, %v511_v41  ;;  %v1492_v45 = vpop.f32.mrb[2].mxu1 }
  0xdc   :  { %v395_v44 = vadd.f32 %v1460_v42, %v1741_v34  ;;  %v386_v46 = vpop.f32.mrb[3].mxu0  ;;  %v523_v47 = vadd.f32 %v1492_v45, %v1741_v34  ;;  %v514_v49 = vpop.f32.mrb[3].mxu1  ;;  %v640_v50 = vmax.f32 %v392_v36, 0.0  ;;  %v672_v53 = vmax.f32 %v520_v39, 0.0 }
  0xdd   :  { %v387_v48 = vadd.f32 %v1741_v34, %v386_v46  ;;  %v515_v52 = vadd.f32 %v1741_v34, %v514_v49  ;;  %v638_v54 = vmax.f32 %v384_v40, 0.0  ;;  %v670_v57 = vmax.f32 %v512_v43, 0.0 }
  0xde   :  { %v641_v51 = vmax.f32 %v395_v44, 0.0  ;;  %v673_v55 = vmax.f32 %v523_v47, 0.0 }
  0xdf   :  { %v639_v56 = vmax.f32 %v387_v48, 0.0  ;;  %v671_v59 = vmax.f32 %v515_v52, 0.0 }
  0xe0   :  { %v1239_v58 = vpack.c.bf16 %v641_v51, %v640_v50  ;;  %v1319_v60 = vpack.c.bf16 %v673_v55, %v672_v53 }
  0xe1   :  { %v1234_v61 = vpack.c.bf16 %v639_v56, %v638_v54  ;;  %v1463_v62 = vpop.f32.mrb[4].mxu0  ;;  %v1314_v63 = vpack.c.bf16 %v671_v59, %v670_v57  ;;  %v1495_v1 = vpop.f32.mrb[4].mxu1 }
  0xe2   :  { %1391 = vst [vmem:[#allocation2 + $0x8] sm:$0xff] %v1239_v58   ;;  %v408_v0 = vadd.f32 %v1463_v62, %v1741_v34  ;;  %v399_v2 = vpop.f32.mrb[5].mxu0  ;;  %1407 = vst [vmem:[#allocation2 + $0x88] sm:$0xff] %v1319_v60   ;;  %v536_v3 = vadd.f32 %v1495_v1, %v1741_v34  ;;  %v527_v5 = vpop.f32.mrb[5].mxu1 }
  0xe3   :  { %1235 = vst [vmem:[#allocation2] sm:$0xff] %v1234_v61   ;;  %v400_v4 = vadd.f32 %v1741_v34, %v399_v2  ;;  %v1464_v6 = vpop.f32.mrb[6].mxu0  ;;  %1406 = vst [vmem:[#allocation2 + $0x80] sm:$0xff] %v1314_v63   ;;  %v528_v7 = vadd.f32 %v1741_v34, %v527_v5  ;;  %v1496_v9 = vpop.f32.mrb[6].mxu1 }
  0xe4   :  { %v411_v8 = vadd.f32 %v1464_v6, %v1741_v34  ;;  %v402_v10 = vpop.f32.mrb[7].mxu0  ;;  %v539_v11 = vadd.f32 %v1496_v9, %v1741_v34  ;;  %v530_v13 = vpop.f32.mrb[7].mxu1  ;;  %v644_v14 = vmax.f32 %v408_v0, 0.0  ;;  %v676_v17 = vmax.f32 %v536_v3, 0.0 }
  0xe5   :  { %v403_v12 = vadd.f32 %v1741_v34, %v402_v10  ;;  %v531_v16 = vadd.f32 %v1741_v34, %v530_v13  ;;  %v642_v18 = vmax.f32 %v400_v4, 0.0  ;;  %v674_v21 = vmax.f32 %v528_v7, 0.0 }
  0xe6   :  { %v645_v15 = vmax.f32 %v411_v8, 0.0  ;;  %v677_v19 = vmax.f32 %v539_v11, 0.0 }
  0xe7   :  { %v643_v20 = vmax.f32 %v403_v12, 0.0  ;;  %v675_v23 = vmax.f32 %v531_v16, 0.0 }
  0xe8   :  { %v1249_v22 = vpack.c.bf16 %v645_v15, %v644_v14  ;;  %v1329_v24 = vpack.c.bf16 %v677_v19, %v676_v17 }
  0xe9   :  { %v1244_v25 = vpack.c.bf16 %v643_v20, %v642_v18  ;;  %v1467_v26 = vpop.f32.mrb[8].mxu0  ;;  %v1324_v27 = vpack.c.bf16 %v675_v23, %v674_v21  ;;  %v1499_v29 = vpop.f32.mrb[8].mxu1 }
  0xea   :  { %1393 = vst [vmem:[#allocation2 + $0x18] sm:$0xff] %v1249_v22   ;;  %v424_v28 = vadd.f32 %v1467_v26, %v1741_v34  ;;  %v415_v30 = vpop.f32.mrb[9].mxu0  ;;  %1409 = vst [vmem:[#allocation2 + $0x98] sm:$0xff] %v1329_v24   ;;  %v552_v31 = vadd.f32 %v1499_v29, %v1741_v34  ;;  %v543_v33 = vpop.f32.mrb[9].mxu1 }
  0xeb   :  { %1392 = vst [vmem:[#allocation2 + $0x10] sm:$0xff] %v1244_v25   ;;  %v416_v32 = vadd.f32 %v1741_v34, %v415_v30  ;;  %v1468_v35 = vpop.f32.mrb[10].mxu0  ;;  %1408 = vst [vmem:[#allocation2 + $0x90] sm:$0xff] %v1324_v27   ;;  %v544_v36 = vadd.f32 %v1741_v34, %v543_v33  ;;  %v1500_v38 = vpop.f32.mrb[10].mxu1 }
  0xec   :  { %v427_v37 = vadd.f32 %v1468_v35, %v1741_v34  ;;  %v418_v39 = vpop.f32.mrb[11].mxu0  ;;  %v555_v40 = vadd.f32 %v1500_v38, %v1741_v34  ;;  %v546_v42 = vpop.f32.mrb[11].mxu1  ;;  %v648_v43 = vmax.f32 %v424_v28, 0.0  ;;  %v680_v46 = vmax.f32 %v552_v31, 0.0 }
  0xed   :  { %v419_v41 = vadd.f32 %v1741_v34, %v418_v39  ;;  %v547_v45 = vadd.f32 %v1741_v34, %v546_v42  ;;  %v646_v47 = vmax.f32 %v416_v32, 0.0  ;;  %v678_v50 = vmax.f32 %v544_v36, 0.0 }
  0xee   :  { %v649_v44 = vmax.f32 %v427_v37, 0.0  ;;  %v681_v48 = vmax.f32 %v555_v40, 0.0 }
  0xef   :  { %v647_v49 = vmax.f32 %v419_v41, 0.0  ;;  %v679_v52 = vmax.f32 %v547_v45, 0.0 }
  0xf0   :  { %v1259_v51 = vpack.c.bf16 %v649_v44, %v648_v43  ;;  %v1339_v53 = vpack.c.bf16 %v681_v48, %v680_v46 }
  0xf1   :  { %v1254_v54 = vpack.c.bf16 %v647_v49, %v646_v47  ;;  %v1471_v55 = vpop.f32.mrb[12].mxu0  ;;  %v1334_v56 = vpack.c.bf16 %v679_v52, %v678_v50  ;;  %v1503_v58 = vpop.f32.mrb[12].mxu1 }
  0xf2   :  { %1395 = vst [vmem:[#allocation2 + $0x28] sm:$0xff] %v1259_v51   ;;  %v440_v57 = vadd.f32 %v1471_v55, %v1741_v34  ;;  %v431_v59 = vpop.f32.mrb[13].mxu0  ;;  %1411 = vst [vmem:[#allocation2 + $0xa8] sm:$0xff] %v1339_v53   ;;  %v568_v60 = vadd.f32 %v1503_v58, %v1741_v34  ;;  %v559_v62 = vpop.f32.mrb[13].mxu1 }
  0xf3   :  { %1394 = vst [vmem:[#allocation2 + $0x20] sm:$0xff] %v1254_v54   ;;  %v432_v61 = vadd.f32 %v1741_v34, %v431_v59  ;;  %v1472_v63 = vpop.f32.mrb[14].mxu0  ;;  %1410 = vst [vmem:[#allocation2 + $0xa0] sm:$0xff] %v1334_v56   ;;  %v560_v0 = vadd.f32 %v1741_v34, %v559_v62  ;;  %v1504_v2 = vpop.f32.mrb[14].mxu1 }
  0xf4   :  { %v443_v1 = vadd.f32 %v1472_v63, %v1741_v34  ;;  %v434_v3 = vpop.f32.mrb[15].mxu0  ;;  %v571_v4 = vadd.f32 %v1504_v2, %v1741_v34  ;;  %v562_v6 = vpop.f32.mrb[15].mxu1  ;;  %v652_v7 = vmax.f32 %v440_v57, 0.0  ;;  %v684_v10 = vmax.f32 %v568_v60, 0.0 }
  0xf5   :  { %v435_v5 = vadd.f32 %v1741_v34, %v434_v3  ;;  %v563_v9 = vadd.f32 %v1741_v34, %v562_v6  ;;  %v650_v11 = vmax.f32 %v432_v61, 0.0  ;;  %v682_v14 = vmax.f32 %v560_v0, 0.0 }
  0xf6   :  { %v653_v8 = vmax.f32 %v443_v1, 0.0  ;;  %v685_v12 = vmax.f32 %v571_v4, 0.0 }
  0xf7   :  { %v651_v13 = vmax.f32 %v435_v5, 0.0  ;;  %v683_v16 = vmax.f32 %v563_v9, 0.0 }
  0xf8   :  { %v1269_v15 = vpack.c.bf16 %v653_v8, %v652_v7  ;;  %v1349_v17 = vpack.c.bf16 %v685_v12, %v684_v10 }
  0xf9   :  { %v1264_v18 = vpack.c.bf16 %v651_v13, %v650_v11  ;;  %v1475_v19 = vpop.f32.mrb[16].mxu0  ;;  %v1344_v20 = vpack.c.bf16 %v683_v16, %v682_v14  ;;  %v1507_v22 = vpop.f32.mrb[16].mxu1 }
  0xfa   :  { %1397 = vst [vmem:[#allocation2 + $0x38] sm:$0xff] %v1269_v15   ;;  %v456_v21 = vadd.f32 %v1475_v19, %v1741_v34  ;;  %v447_v23 = vpop.f32.mrb[17].mxu0  ;;  %1413 = vst [vmem:[#allocation2 + $0xb8] sm:$0xff] %v1349_v17   ;;  %v584_v24 = vadd.f32 %v1507_v22, %v1741_v34  ;;  %v575_v26 = vpop.f32.mrb[17].mxu1 }
  0xfb   :  { %1396 = vst [vmem:[#allocation2 + $0x30] sm:$0xff] %v1264_v18   ;;  %v448_v25 = vadd.f32 %v1741_v34, %v447_v23  ;;  %v1476_v27 = vpop.f32.mrb[18].mxu0  ;;  %1412 = vst [vmem:[#allocation2 + $0xb0] sm:$0xff] %v1344_v20   ;;  %v576_v28 = vadd.f32 %v1741_v34, %v575_v26  ;;  %v1508_v30 = vpop.f32.mrb[18].mxu1 }
  0xfc   :  { %v459_v29 = vadd.f32 %v1476_v27, %v1741_v34  ;;  %v450_v31 = vpop.f32.mrb[19].mxu0  ;;  %v587_v32 = vadd.f32 %v1508_v30, %v1741_v34  ;;  %v578_v35 = vpop.f32.mrb[19].mxu1  ;;  %v656_v36 = vmax.f32 %v456_v21, 0.0  ;;  %v688_v39 = vmax.f32 %v584_v24, 0.0 }
  0xfd   :  { %v451_v33 = vadd.f32 %v1741_v34, %v450_v31  ;;  %v579_v38 = vadd.f32 %v1741_v34, %v578_v35  ;;  %v654_v40 = vmax.f32 %v448_v25, 0.0  ;;  %v686_v43 = vmax.f32 %v576_v28, 0.0 }
  0xfe   :  { %v657_v37 = vmax.f32 %v459_v29, 0.0  ;;  %v689_v41 = vmax.f32 %v587_v32, 0.0 }
  0xff   :  { %v655_v42 = vmax.f32 %v451_v33, 0.0  ;;  %v687_v45 = vmax.f32 %v579_v38, 0.0 }
 0x100   :  { %v1279_v44 = vpack.c.bf16 %v657_v37, %v656_v36  ;;  %v1359_v46 = vpack.c.bf16 %v689_v41, %v688_v39 }
 0x101   :  { %v1274_v47 = vpack.c.bf16 %v655_v42, %v654_v40  ;;  %v1479_v48 = vpop.f32.mrb[20].mxu0  ;;  %v1354_v49 = vpack.c.bf16 %v687_v45, %v686_v43  ;;  %v1511_v51 = vpop.f32.mrb[20].mxu1 }
 0x102   :  { %1399 = vst [vmem:[#allocation2 + $0x48] sm:$0xff] %v1279_v44   ;;  %v472_v50 = vadd.f32 %v1479_v48, %v1741_v34  ;;  %v463_v52 = vpop.f32.mrb[21].mxu0  ;;  %1415 = vst [vmem:[#allocation2 + $0xc8] sm:$0xff] %v1359_v46   ;;  %v600_v53 = vadd.f32 %v1511_v51, %v1741_v34  ;;  %v591_v55 = vpop.f32.mrb[21].mxu1 }
 0x103   :  { %1398 = vst [vmem:[#allocation2 + $0x40] sm:$0xff] %v1274_v47   ;;  %v464_v54 = vadd.f32 %v1741_v34, %v463_v52  ;;  %v1480_v56 = vpop.f32.mrb[22].mxu0  ;;  %1414 = vst [vmem:[#allocation2 + $0xc0] sm:$0xff] %v1354_v49   ;;  %v592_v57 = vadd.f32 %v1741_v34, %v591_v55  ;;  %v1512_v59 = vpop.f32.mrb[22].mxu1 }
 0x104   :  { %v475_v58 = vadd.f32 %v1480_v56, %v1741_v34  ;;  %v466_v60 = vpop.f32.mrb[23].mxu0  ;;  %v603_v61 = vadd.f32 %v1512_v59, %v1741_v34  ;;  %v594_v63 = vpop.f32.mrb[23].mxu1  ;;  %v660_v0 = vmax.f32 %v472_v50, 0.0  ;;  %v692_v3 = vmax.f32 %v600_v53, 0.0 }
 0x105   :  { %v467_v62 = vadd.f32 %v1741_v34, %v466_v60  ;;  %v595_v2 = vadd.f32 %v1741_v34, %v594_v63  ;;  %v658_v4 = vmax.f32 %v464_v54, 0.0  ;;  %v690_v7 = vmax.f32 %v592_v57, 0.0 }
 0x106   :  { %v661_v1 = vmax.f32 %v475_v58, 0.0  ;;  %v693_v5 = vmax.f32 %v603_v61, 0.0 }
 0x107   :  { %v659_v6 = vmax.f32 %v467_v62, 0.0  ;;  %v691_v9 = vmax.f32 %v595_v2, 0.0 }
 0x108   :  { %v1289_v8 = vpack.c.bf16 %v661_v1, %v660_v0  ;;  %v1369_v10 = vpack.c.bf16 %v693_v5, %v692_v3 }
 0x109   :  { %v1284_v11 = vpack.c.bf16 %v659_v6, %v658_v4  ;;  %v1483_v12 = vpop.f32.mrb[24].mxu0  ;;  %v1364_v13 = vpack.c.bf16 %v691_v9, %v690_v7  ;;  %v1515_v15 = vpop.f32.mrb[24].mxu1 }
 0x10a   :  { %1401 = vst [vmem:[#allocation2 + $0x58] sm:$0xff] %v1289_v8   ;;  %v488_v14 = vadd.f32 %v1483_v12, %v1741_v34  ;;  %v479_v16 = vpop.f32.mrb[25].mxu0  ;;  %1417 = vst [vmem:[#allocation2 + $0xd8] sm:$0xff] %v1369_v10   ;;  %v616_v17 = vadd.f32 %v1515_v15, %v1741_v34  ;;  %v607_v19 = vpop.f32.mrb[25].mxu1 }
 0x10b   :  { %1400 = vst [vmem:[#allocation2 + $0x50] sm:$0xff] %v1284_v11   ;;  %v480_v18 = vadd.f32 %v1741_v34, %v479_v16  ;;  %v1484_v20 = vpop.f32.mrb[26].mxu0  ;;  %1416 = vst [vmem:[#allocation2 + $0xd0] sm:$0xff] %v1364_v13   ;;  %v608_v21 = vadd.f32 %v1741_v34, %v607_v19  ;;  %v1516_v23 = vpop.f32.mrb[26].mxu1 }
 0x10c   :  { %v491_v22 = vadd.f32 %v1484_v20, %v1741_v34  ;;  %v482_v24 = vpop.f32.mrb[27].mxu0  ;;  %v619_v25 = vadd.f32 %v1516_v23, %v1741_v34  ;;  %v610_v27 = vpop.f32.mrb[27].mxu1  ;;  %v664_v28 = vmax.f32 %v488_v14, 0.0  ;;  %v696_v31 = vmax.f32 %v616_v17, 0.0 }
 0x10d   :  { %v483_v26 = vadd.f32 %v1741_v34, %v482_v24  ;;  %v611_v30 = vadd.f32 %v1741_v34, %v610_v27  ;;  %v662_v32 = vmax.f32 %v480_v18, 0.0  ;;  %v694_v36 = vmax.f32 %v608_v21, 0.0 }
 0x10e   :  { %v665_v29 = vmax.f32 %v491_v22, 0.0  ;;  %v697_v33 = vmax.f32 %v619_v25, 0.0 }
 0x10f   :  { %v663_v35 = vmax.f32 %v483_v26, 0.0  ;;  %v695_v38 = vmax.f32 %v611_v30, 0.0 }
 0x110   :  { %v1299_v37 = vpack.c.bf16 %v665_v29, %v664_v28  ;;  %v1379_v39 = vpack.c.bf16 %v697_v33, %v696_v31 }
 0x111   :  { %v1294_v40 = vpack.c.bf16 %v663_v35, %v662_v32  ;;  %v1487_v41 = vpop.f32.mrb[28].mxu0  ;;  %v1374_v42 = vpack.c.bf16 %v695_v38, %v694_v36  ;;  %v1519_v44 = vpop.f32.mrb[28].mxu1 }
 0x112   :  { %1403 = vst [vmem:[#allocation2 + $0x68] sm:$0xff] %v1299_v37   ;;  %v504_v43 = vadd.f32 %v1487_v41, %v1741_v34  ;;  %v495_v45 = vpop.f32.mrb[29].mxu0  ;;  %1419 = vst [vmem:[#allocation2 + $0xe8] sm:$0xff] %v1379_v39   ;;  %v632_v46 = vadd.f32 %v1519_v44, %v1741_v34  ;;  %v623_v48 = vpop.f32.mrb[29].mxu1 }
 0x113   :  { %1402 = vst [vmem:[#allocation2 + $0x60] sm:$0xff] %v1294_v40   ;;  %v496_v47 = vadd.f32 %v1741_v34, %v495_v45  ;;  %v1488_v49 = vpop.f32.mrb[30].mxu0  ;;  %1418 = vst [vmem:[#allocation2 + $0xe0] sm:$0xff] %v1374_v42   ;;  %v624_v50 = vadd.f32 %v1741_v34, %v623_v48  ;;  %v1520_v52 = vpop.f32.mrb[30].mxu1 }
 0x114   :  { %v507_v51 = vadd.f32 %v1488_v49, %v1741_v34  ;;  %v498_v53 = vpop.f32.mrb[31].mxu0  ;;  %v635_v54 = vadd.f32 %v1520_v52, %v1741_v34  ;;  %v626_v56 = vpop.f32.mrb[31].mxu1  ;;  %v668_v57 = vmax.f32 %v504_v43, 0.0  ;;  %v700_v60 = vmax.f32 %v632_v46, 0.0 }
 0x115   :  { %v499_v55 = vadd.f32 %v1741_v34, %v498_v53  ;;  %v627_v59 = vadd.f32 %v1741_v34, %v626_v56  ;;  %v666_v61 = vmax.f32 %v496_v47, 0.0  ;;  %v698_v0 = vmax.f32 %v624_v50, 0.0 }
 0x116   :  { %v669_v58 = vmax.f32 %v507_v51, 0.0  ;;  %v701_v62 = vmax.f32 %v635_v54, 0.0 }
 0x117   :  { %v667_v63 = vmax.f32 %v499_v55, 0.0  ;;  %v699_v2 = vmax.f32 %v627_v59, 0.0 }
 0x118   :  { %v1309_v1 = vpack.c.bf16 %v669_v58, %v668_v57  ;;  %v1389_v3 = vpack.c.bf16 %v701_v62, %v700_v60 }
 0x119   :  { %v1304_v4 = vpack.c.bf16 %v667_v63, %v666_v61  ;;  %v1384_v5 = vpack.c.bf16 %v699_v2, %v698_v0 }
 0x11a   :  { %1405 = vst [vmem:[#allocation2 + $0x78] sm:$0xff] %v1309_v1   ;;  %1421 = vst [vmem:[#allocation2 + $0xf8] sm:$0xff] %v1389_v3  }
 0x11b   :  { %1404 = vst [vmem:[#allocation2 + $0x70] sm:$0xff] %v1304_v4   ;;  %1420 = vst [vmem:[#allocation2 + $0xf0] sm:$0xff] %v1384_v5  }
 0x11c   :  { %1571 = shalt.err (!%p1568_p4)
}
 0x11d   :  { %s1572_s26 = scalar_lea.hbm %s1822_s3, 4096 }
 0x11e   :  { %p1573_p5 = scmp.ne.s32.totalorder %s1822_s3, %s1572_s26  ;;  %p1576_p6 = scmp.lt.u32.totalorder %s1572_s26, %s1822_s3 }
 0x120   :  { %p1578_p7 = pnand %p1576_p6, %p1573_p5 }
 0x122   :  { %1581 = shalt.err (!%p1578_p7)
}
 0x123   :  { %s1585_s4 = smov 64   ;;  %s1586_s5 = smov 4  }
 0x124   :  { %1033 = dma.vmem_to_hbm [thread:$0]  %s1028_s2, 4096, %s1822_s3, [#allocation3], %s1585_s4, %s1585_s4, %s1586_s5  }
 0x125   :  { %1582 = dma.done.wait [#allocation3], 4096  }
 0x126   :  { %1583 = vsyncadd [#allocation3], 4294963200 }
 0x127   :  { %1037 = vsyncpa [#allocation3], 1 }

</bundles_post_ra>
